<compile_context>
chip_gen: v7x
topology: tpu7x:2x2x1
jax: 0.10.0
libtpu: 0.0.40
codegen_flags: <defaults>
</compile_context>

<pallas_src>
import jax
import jax.numpy as jnp
from jax.experimental import pallas as pl
from jax.experimental.pallas import tpu as pltpu

FEAT = 40                      # trailing feature dim (my_buffer has 40 elems)
MAX_BLOCK_ROWS = 14336         # 14336 * 128 lanes * 4 B = 7 MiB VMEM per buffer
FORCE_SPLIT_ROWS = 16384       # above this, force >= 2 grid steps (v7x megacore)
SMALL_BYTES = 1 << 20          # below ~1 MiB a plain XLA fusion wins end-to-end


def _add_kernel(buf_ref, x_ref, o_ref):
    # buf_ref: (1, FEAT) f32 in VMEM (scalar parameter already folded in),
    # x_ref / o_ref: (tb, FEAT) f32 in VMEM.  Pure VPU broadcast add.
    o_ref[...] = x_ref[...] + buf_ref[...]


def _choose_tile(batch: int) -> tuple[int, int]:
    """Pick (rows_per_block, n_grid_steps): /8-aligned, minimal tail, VMEM-safe."""
    rows8 = pl.cdiv(batch, 8) * 8
    n_steps = pl.cdiv(rows8, MAX_BLOCK_ROWS)
    if rows8 > FORCE_SPLIT_ROWS:
        n_steps = max(n_steps, 2)          # ensure both v7x TensorCores issue DMAs
    tb = pl.cdiv(pl.cdiv(rows8, n_steps), 8) * 8
    tb = min(tb, MAX_BLOCK_ROWS)
    return tb, pl.cdiv(batch, tb)


def basic_forward(x: jax.Array, to_add: jax.Array, my_buffer: jax.Array,
                  *, force_pallas: bool = False) -> jax.Array:
    """out = x + to_add + my_buffer, with x of shape (B, 40), f32."""
    batch, feat = x.shape
    assert feat == FEAT and my_buffer.shape[-1] == FEAT

    combined = (my_buffer + to_add).astype(x.dtype)       # (40,): fold scalar param
    itemsize = x.dtype.itemsize

    if not force_pallas and batch * FEAT * itemsize < SMALL_BYTES:
        # Latency-dominated regime: XLA's elementwise fusion already hits the
        # HBM roofline for a broadcast add, without any kernel-launch overhead.
        return x + combined

    tb, n_steps = _choose_tile(batch)
    buf2d = combined.reshape(1, FEAT)

    return pl.pallas_call(
        _add_kernel,
        out_shape=jax.ShapeDtypeStruct((batch, FEAT), x.dtype),
        grid=(n_steps,),
        in_specs=[
            pl.BlockSpec((1, FEAT), lambda i: (0, 0)),     # folded buffer (tiny)
            pl.BlockSpec((tb, FEAT), lambda i: (i, 0)),    # x tile (double-buffered)
        ],
        out_specs=pl.BlockSpec((tb, FEAT), lambda i: (i, 0)),
        compiler_params=pltpu.CompilerParams(
            dimension_semantics=("parallel",),
            vmem_limit_bytes=32 * 1024 * 1024,   # explicit: safe on v5e (16 MiB default)
        ),
        cost_estimate=pl.CostEstimate(
            flops=batch * FEAT,
            transcendentals=0,
            bytes_accessed=2 * batch * FEAT * itemsize + FEAT * itemsize,
        ),
    )(buf2d, x)


if __name__ == "__main__":
    # Deterministic parameter / buffer init, matching nn.Module __init__:
    #   to_add    = Parameter(torch.ones(1))  -> 1.0
    #   my_buffer = torch.ones(40) * 3        -> 3.0 each
    to_add = jnp.ones((1,), dtype=jnp.float32)
    my_buffer = jnp.ones((FEAT,), dtype=jnp.float32) * 3.0

    key = jax.random.PRNGKey(0)
    batch = 10   # not a multiple of 8 -> exercises the clipped (no-pad) tail block
    x = jax.random.normal(key, (batch, FEAT), dtype=jnp.float32)

    out = jax.block_until_ready(
        basic_forward(x, to_add, my_buffer, force_pallas=True))

    # Correctness check against the pure-JAX reference of the torch forward.
    ref = x + to_add + my_buffer
    assert out.shape == ref.shape and out.dtype == ref.dtype
    assert jnp.allclose(out, ref), "mismatch vs reference"

    print("KERNEL_OK")
</pallas_src>

<mosaic_0001>
module attributes {stable_mosaic.version = 11 : i64} {
  func.func @_add_kernel(%arg0: i32, %arg1: memref<1x40xf32, #tpu.memory_space<vmem>>, %arg2: memref<16x40xf32, #tpu.memory_space<vmem>>, %arg3: memref<16x40xf32, #tpu.memory_space<vmem>>) attributes {dimension_semantics = [#tpu.dimension_semantics<parallel>], iteration_bounds = array<i64: 1>, scalar_prefetch = 0 : i64, scratch_operands = 0 : i64, tpu.core_type = #tpu.core_type<tc>, window_params = [{pipeline_mode = #tpu.pipeline_mode<synchronous>, transform_indices = @transform_0, window_bounds = array<i64: 1, 40>}, {transform_indices = @transform_1, window_bounds = array<i64: 16, 40>}, {transform_indices = @transform_2, window_bounds = array<i64: 16, 40>}]} {
    %c0 = arith.constant 0 : index
    %c0_0 = arith.constant 0 : index
    %0 = vector.load %arg2[%c0, %c0_0] : memref<16x40xf32, #tpu.memory_space<vmem>>, vector<16x40xf32>
    %c0_1 = arith.constant 0 : index
    %c0_2 = arith.constant 0 : index
    %1 = vector.load %arg1[%c0_1, %c0_2] : memref<1x40xf32, #tpu.memory_space<vmem>>, vector<1x40xf32>
    %2 = vector.broadcast %1 : vector<1x40xf32> to vector<16x40xf32>
    %3 = arith.addf %0, %2 : vector<16x40xf32>
    %c0_3 = arith.constant 0 : index
    %c0_4 = arith.constant 0 : index
    %4 = vector.load %arg3[%c0_3, %c0_4] : memref<16x40xf32, #tpu.memory_space<vmem>>, vector<16x40xf32>
    tpu.vector_store %arg3[%c0_3, %c0_4], %3 {strides = array<i32>} : memref<16x40xf32, #tpu.memory_space<vmem>>, vector<16x40xf32>,
    return
  }
  func.func @transform_0(%arg0: i32) -> (i32, i32) {
    %c0_i32 = arith.constant 0 : i32
    %c0_i32_0 = arith.constant 0 : i32
    %c0_i32_1 = arith.constant 0 : i32
    return %c0_i32, %c0_i32_0 : i32, i32
  }
  func.func @transform_1(%arg0: i32) -> (i32, i32) {
    %c0_i32 = arith.constant 0 : i32
    %c0_i32_0 = arith.constant 0 : i32
    return %arg0, %c0_i32 : i32, i32
  }
  func.func @transform_2(%arg0: i32) -> (i32, i32) {
    %c0_i32 = arith.constant 0 : i32
    %c0_i32_0 = arith.constant 0 : i32
    return %arg0, %c0_i32 : i32, i32
  }
}

</mosaic_0001>

<bundles_post_ra>
// kernel: tpu_custom_call.1
= control target key start
LH: loop header
LB: loop body
LE: loop exit
PB: predicated region body
PF: predicated region fallthrough
CT: control target
= control target key end

     0   :  { %7 = vsyncpa [#allocation3], 0  ;;  %s217_s0 = inlined_call_operand.hbm [shape: f32[1,40], index: 0, kind: input, shape index: {}]   ;;  %s218_s1 = inlined_call_operand.hbm [shape: f32[10,40], index: 1, kind: input, shape index: {}]   ;;  %s219_s2 = inlined_call_operand.hbm [shape: f32[10,40], index: 2, kind: output, shape index: {}]  }
   0x1   :  { %8 = vsyncpa [#allocation6], 0 }
   0x2   :  { %9 = vsyncpa [#allocation4], 0  ;;  %s148_s9 = smov [#allocation2]   ;;  %s149_s11 = smov [#allocation5]  }
   0x3   :  { %s16_s10 = sshll.u32 %s148_s9, 4  ;;  %s25_s12 = sshll.u32 %s149_s11, 4  ;;  %s17_s10 = int_to_ptr.vmem [resolvable:$true] %s16_s10  ;;  %s168_s12 = int_to_ptr.vmem [resolvable:$true] %s25_s12 }
   0x4   :  { %s76_s15 = scalar_lea.hbm %s217_s0, 16 }
   0x5   :  { %p77_p0 = scmp.ne.s32.totalorder %s217_s0, %s76_s15  ;;  %p80_p1 = scmp.lt.u32.totalorder %s76_s15, %s217_s0 }
   0x7   :  { %p82_p2 = pnand %p80_p1, %p77_p0 }
   0x9   :  { %85 = shalt.err (!%p82_p2)
}
   0xa   :  { %s86_s20 = scalar_lea.vmem %s17_s10, 16  ;;  %s90_s21 = scalar_lea.vmem %s17_s10, 32 }
   0xb   :  { %p87_p3 = scmp.ne.s32.totalorder %s17_s10, %s86_s20  ;;  %p91_p4 = scmp.lt.s32.totalorder %s17_s10, %s17_s10 }
   0xc   :  { %p92_p5 = scmp.lt.s32.totalorder %s90_s21, %s86_s20 }
   0xe   :  { %p93_p6 = por %p92_p5, %p91_p4 }
  0x10   :  { %p94_p7 = pnand %p93_p6, %p87_p3 }
  0x12   :  { %97 = shalt.err (!%p94_p7)
}
  0x13   :  { %19 = dma.hbm_to_vmem [thread:$0]  %s217_s0, 16, %s17_s10, [#allocation3]  }
  0x14   :  { %s98_s26 = scalar_lea.hbm %s218_s1, 256 }
  0x15   :  { %p99_p8 = scmp.ne.s32.totalorder %s218_s1, %s98_s26  ;;  %p102_p9 = scmp.lt.u32.totalorder %s98_s26, %s218_s1 }
  0x17   :  { %p104_p10 = pnand %p102_p9, %p99_p8 }
  0x19   :  { %107 = shalt.err (!%p104_p10)
}
  0x1a   :  { %s108_s3 = scalar_lea.vmem %s168_s12, 256  ;;  %p113_p12 = scmp.lt.s32.totalorder %s168_s12, %s168_s12 }
  0x1b   :  { %p109_p11 = scmp.ne.s32.totalorder %s168_s12, %s108_s3  ;;  %p114_p13 = scmp.lt.s32.totalorder %s108_s3, %s108_s3 }
  0x1d   :  { %p115_p0 = por %p114_p13, %p113_p12 }
  0x1f   :  { %p116_p1 = pnand %p115_p0, %p109_p11 }
  0x21   :  { %119 = shalt.err (!%p116_p1)
}
  0x22   :  { %s150_s0 = smov 128   ;;  %s151_s4 = smov 8  }
  0x23   :  { %31 = dma.hbm_to_vmem [thread:$0]  %s218_s1, 256, %s168_s12, [#allocation6], %s150_s0, %s150_s0, %s151_s4  }
  0x24   :  { %142 = dma.done.wait [#allocation3], 16  }
  0x25   :  { %143 = vsyncadd [#allocation3], 4294967280 }
  0x26   :  { %144 = dma.done.wait [#allocation6], 256  }
  0x27   :  { %145 = vsyncadd [#allocation6], 4294967040  ;;  %s152_s7 = smov [#allocation7]   ;;  %v38_v0 = vld [vmem:[#allocation5] sm:$0xff]  ;;  %v70_v1 = vld [vmem:[#allocation2] ss:$0 sm:$0xff] }
  0x28   :  { %s57_s8 = sshll.u32 %s152_s7, 4  ;;  %vm49_vm0 = vcmask 326656   ;;  %v39_v2 = vld [vmem:[#allocation5 + $0x8] sm:$0xff]  ;;  %v47_v3 = vadd.f32 %v70_v1, %v38_v0  ;;  %s58_s8 = int_to_ptr.vmem [resolvable:$true] %s57_s8 }
  0x29   :  { %v48_v4 = vadd.f32 %v70_v1, %v39_v2  ;;  %s120_s9 = scalar_lea.vmem %s58_s8, 256  ;;  %p125_p3 = scmp.lt.s32.totalorder %s58_s8, %s58_s8 }
  0x2a   :  { %50 = vst.msk [vmem:[#allocation7] sm:$0xff] %vm49_vm0, %v47_v3  ;;  %p121_p2 = scmp.ne.s32.totalorder %s58_s8, %s120_s9  ;;  %p126_p4 = scmp.lt.s32.totalorder %s120_s9, %s120_s9 }
  0x2b   :  { %51 = vst.msk [vmem:[#allocation7 + $0x8] sm:$0xff] %vm49_vm0, %v48_v4 }
  0x2c   :  { %p127_p5 = por %p126_p4, %p125_p3 }
  0x2e   :  { %p128_p6 = pnand %p127_p5, %p121_p2 }
  0x30   :  { %131 = shalt.err (!%p128_p6)
}
  0x31   :  { %s132_s11 = scalar_lea.hbm %s219_s2, 256 }
  0x32   :  { %p133_p7 = scmp.ne.s32.totalorder %s219_s2, %s132_s11  ;;  %p136_p8 = scmp.lt.u32.totalorder %s132_s11, %s219_s2 }
  0x34   :  { %p138_p9 = pnand %p136_p8, %p133_p7 }
  0x36   :  { %141 = shalt.err (!%p138_p9)
}
  0x37   :  { %63 = dma.vmem_to_hbm [thread:$0]  %s58_s8, 256, %s219_s2, [#allocation4], %s150_s0, %s150_s0, %s151_s4  }
  0x38   :  { %146 = dma.done.wait [#allocation4], 256  }
  0x39   :  { %147 = vsyncadd [#allocation4], 4294967040 }
  0x3a   :  { %67 = vsyncpa [#allocation3], 1 }
  0x3b   :  { %68 = vsyncpa [#allocation6], 1 }
  0x3c   :  { %69 = vsyncpa [#allocation4], 1 }

</bundles_post_ra>
